<compile_context>
chip_gen: v7x
topology: tpu7x:2x2x1
jax: 0.10.0
libtpu: 0.0.40
codegen_flags: <defaults>
</compile_context>

<pallas_src>
import functools

import jax
import jax.numpy as jnp
from jax.experimental import pallas as pl
from jax.experimental.pallas import tpu as pltpu


def align_head_kernel(x_ref, w1_ref, t1_ref, w2_ref, t2_ref, w3_ref, b3_ref,
                      out_ref, acc_ref, *, seq_len):
    """Fused MLP (2x Linear[BN-folded]+Swish) -> mean-pool over L -> head Linear.

    Grid: (B, L // tile_l). Axis 0 = batch ("parallel"), axis 1 = sequence
    reduction ("arbitrary"). acc_ref is an (8, H) partial-sum accumulator; the
    cross-sublane reduce and head matmul happen only on the last L step.
    """
    l = pl.program_id(1)

    @pl.when(l == 0)
    def _init():
        acc_ref[...] = jnp.zeros_like(acc_ref)

    # x tile in bf16 for the MXU; accumulation stays f32 (preferred_element_type).
    x = x_ref[...].astype(jnp.bfloat16)                                 # (tl, C)
    tl = x.shape[0]

    # Linear1 (BN1 scale folded into W1) + BN1 shift + Swish (f32 elementwise;
    # sigmoid goes to the EUP, mul to the VALU -> overlaps with the next dot).
    z1 = jnp.dot(x, w1_ref[...], preferred_element_type=jnp.float32)
    z1 = z1 + t1_ref[...]
    h1 = z1 * jax.nn.sigmoid(z1)                                        # (tl, C) f32

    # Linear2 (BN2 scale folded into W2) + BN2 shift + Swish.
    z2 = jnp.dot(h1.astype(jnp.bfloat16), w2_ref[...],
                 preferred_element_type=jnp.float32)
    z2 = z2 + t2_ref[...]
    h2 = z2 * jax.nn.sigmoid(z2)                                        # (tl, H) f32

    # Accumulate partial sums for the average pool. Per-step work is plain
    # VALU vreg adds into the (8, H) accumulator (the reshape keeps each
    # (8,128) tile intact); the single sublane (XLU) reduce is deferred to
    # the finalize step.
    hdim = h2.shape[-1]
    if tl % 8 == 0:
        acc_ref[...] += h2.reshape(tl // 8, 8, hdim).sum(axis=0)
    else:
        acc_ref[0:1, :] += jnp.sum(h2, axis=0, keepdims=True)

    @pl.when(l == pl.num_programs(1) - 1)
    def _finalize():
        pooled = jnp.sum(acc_ref[...], axis=0, keepdims=True) * (1.0 / seq_len)
        logits = jnp.dot(pooled, w3_ref[...],
                         preferred_element_type=jnp.float32) + b3_ref[...]  # (1, NC)
        out_ref[...] = logits[None].astype(out_ref.dtype)               # (1, 1, NC)


def _default_tile_l(L):
    # Prefer big tiles (amortize ~0.35us/step, fill the MXU); keep multiple of 8.
    for cand in (512, 256, 128, 64, 32, 16, 8):
        if L >= cand and L % cand == 0:
            return cand
    return L


def align_head_forward(x, params, *, tile_l=None):
    B, L, C = x.shape
    H = params["w2"].shape[1]
    NC = params["w3"].shape[1]
    tl = _default_tile_l(L) if tile_l is None else tile_l
    assert L % tl == 0, (L, tl)

    kernel = functools.partial(align_head_kernel, seq_len=L)

    out = pl.pallas_call(
        kernel,
        out_shape=jax.ShapeDtypeStruct((B, 1, NC), jnp.float32),
        grid_spec=pltpu.PrefetchScalarGridSpec(
            num_scalar_prefetch=0,
            grid=(B, L // tl),
            in_specs=[
                # x tile; size-1 batch dim squeezed out of the kernel view.
                pl.BlockSpec((None, tl, C), lambda b, l: (b, l, 0)),
                pl.BlockSpec((C, C), lambda b, l: (0, 0)),    # W1 (bf16, BN folded)
                pl.BlockSpec((1, C), lambda b, l: (0, 0)),    # shift1 (f32)
                pl.BlockSpec((C, H), lambda b, l: (0, 0)),    # W2 (bf16, BN folded)
                pl.BlockSpec((1, H), lambda b, l: (0, 0)),    # shift2 (f32)
                pl.BlockSpec((H, NC), lambda b, l: (0, 0)),   # W3 head (f32)
                pl.BlockSpec((1, NC), lambda b, l: (0, 0)),   # b3 head (f32)
            ],
            out_specs=pl.BlockSpec((1, 1, NC), lambda b, l: (b, 0, 0)),
            scratch_shapes=[pltpu.VMEM((8, H), jnp.float32)],
        ),
        compiler_params=pltpu.CompilerParams(
            dimension_semantics=("parallel", "arbitrary"),
            # Explicit VMEM budget; safe on v5e/v6e/v7x. Raise when sweeping
            # tile_l upward (e.g. 1024-row tiles at C=768 on v6e).
            vmem_limit_bytes=32 * 1024 * 1024),
    )(x, params["w1"], params["t1"], params["w2"], params["t2"],
      params["w3"], params["b3"])

    out = out.reshape(B, NC)        # free metadata reshape (drop size-1 dim)
    if B == 1:                      # match PyTorch `.squeeze()` for B == 1
        out = out.reshape(NC)
    return out


def init_params(key, embed_dim, hidden_dim, num_classes, eps=1e-5):
    k1, k2, k3 = jax.random.split(key, 3)
    std = 0.02
    # trunc_normal_(std=0.02) equivalent (deterministic), biases = 0.
    w1 = jax.random.truncated_normal(k1, -2.0, 2.0,
                                     (embed_dim, embed_dim), jnp.float32) * std
    b1 = jnp.zeros((embed_dim,), jnp.float32)
    w2 = jax.random.truncated_normal(k2, -2.0, 2.0,
                                     (embed_dim, hidden_dim), jnp.float32) * std
    b2 = jnp.zeros((hidden_dim,), jnp.float32)
    w3 = jax.random.truncated_normal(k3, -2.0, 2.0,
                                     (hidden_dim, num_classes), jnp.float32) * std
    b3 = jnp.zeros((num_classes,), jnp.float32)

    # Fold eval-mode BatchNorm1d (gamma=1, beta=0, mean=0, var=1) into the
    # preceding Linear: W' = W * scale (per output column),
    # shift = (b - mean) * scale + beta.
    def fold_bn(w, bias, dim):
        gamma = jnp.ones((dim,), jnp.float32)
        beta = jnp.zeros((dim,), jnp.float32)
        mean = jnp.zeros((dim,), jnp.float32)
        var = jnp.ones((dim,), jnp.float32)
        scale = gamma / jnp.sqrt(var + eps)
        w_folded = w * scale[None, :]
        shift = (bias - mean) * scale + beta
        return w_folded, shift.reshape(1, dim)

    w1f, t1 = fold_bn(w1, b1, embed_dim)
    w2f, t2 = fold_bn(w2, b2, hidden_dim)

    return {
        # bf16 weights for the MXU (f32 accumulation in-kernel).
        "w1": w1f.astype(jnp.bfloat16), "t1": t1,
        "w2": w2f.astype(jnp.bfloat16), "t2": t2,
        "w3": w3, "b3": b3.reshape(1, num_classes),
        # f32 copies kept only for the pure-JAX reference check.
        "w1_f32": w1f, "w2_f32": w2f,
    }


def align_head_reference(x, params):
    """Pure-JAX f32 reference with identical (eval-mode) semantics."""
    B, L, C = x.shape
    h = x.reshape(-1, C).astype(jnp.float32)
    z1 = h @ params["w1_f32"] + params["t1"]
    h1 = z1 * jax.nn.sigmoid(z1)
    z2 = h1 @ params["w2_f32"] + params["t2"]
    h2 = z2 * jax.nn.sigmoid(z2)
    H = h2.shape[-1]
    pooled = h2.reshape(B, L, H).mean(axis=1)
    out = pooled @ params["w3"] + params["b3"]
    return out if B > 1 else out.reshape(-1)


if __name__ == "__main__":
    B, L, C = 2, 8, 32          # batch, seq_len, embed_dim
    H, NC = 64, 4               # hidden_dim, num_classes
    # NOTE: at production ViT dims (C>=768, H>=512, L in the hundreds) the lane
    # dim is full; at these toy dims the matmuls are lane-sparse by construction.

    key = jax.random.PRNGKey(0)
    kx, kp = jax.random.split(key)
    x = jax.random.normal(kx, (B, L, C), jnp.float32)
    params = init_params(kp, C, H, NC)

    out = align_head_forward(x, params)
    out = jax.block_until_ready(out)

    ref = align_head_reference(x, params)
    assert out.shape == (B, NC), out.shape
    # bf16 matmul operands (f32 accumulation) -> loosened tolerance vs f32 ref.
    assert jnp.allclose(out, ref, atol=2e-2, rtol=2e-2), (out, ref)

    print("KERNEL_OK")
</pallas_src>

<mosaic_0001>
module attributes {stable_mosaic.version = 11 : i64} {
  func.func @align_head_kernel(%arg0: i32, %arg1: i32, %arg2: memref<1x8x32xf32, #tpu.memory_space<vmem>>, %arg3: memref<32x32xbf16, #tpu.memory_space<vmem>>, %arg4: memref<1x32xf32, #tpu.memory_space<vmem>>, %arg5: memref<32x64xbf16, #tpu.memory_space<vmem>>, %arg6: memref<1x64xf32, #tpu.memory_space<vmem>>, %arg7: memref<64x4xf32, #tpu.memory_space<vmem>>, %arg8: memref<1x4xf32, #tpu.memory_space<vmem>>, %arg9: memref<1x1x4xf32, #tpu.memory_space<vmem>>, %arg10: memref<8x64xf32, #tpu.memory_space<vmem>>) attributes {dimension_semantics = [#tpu.dimension_semantics<parallel>, #tpu.dimension_semantics<arbitrary>], iteration_bounds = array<i64: 2, 1>, scalar_prefetch = 0 : i64, scratch_operands = 1 : i64, tpu.core_type = #tpu.core_type<tc>, window_params = [{transform_indices = @transform_0, window_bounds = array<i64: 1, 8, 32>}, {pipeline_mode = #tpu.pipeline_mode<synchronous>, transform_indices = @transform_1, window_bounds = array<i64: 32, 32>}, {pipeline_mode = #tpu.pipeline_mode<synchronous>, transform_indices = @transform_2, window_bounds = array<i64: 1, 32>}, {pipeline_mode = #tpu.pipeline_mode<synchronous>, transform_indices = @transform_3, window_bounds = array<i64: 32, 64>}, {pipeline_mode = #tpu.pipeline_mode<synchronous>, transform_indices = @transform_4, window_bounds = array<i64: 1, 64>}, {pipeline_mode = #tpu.pipeline_mode<synchronous>, transform_indices = @transform_5, window_bounds = array<i64: 64, 4>}, {pipeline_mode = #tpu.pipeline_mode<synchronous>, transform_indices = @transform_6, window_bounds = array<i64: 1, 4>}, {transform_indices = @transform_7, window_bounds = array<i64: 1, 1, 4>}]} {
    %c0_i32 = arith.constant 0 : i32
    %0 = arith.cmpi eq, %arg1, %c0_i32 : i32
    %1 = arith.extui %0 : i1 to i32
    %c0_i32_0 = arith.constant 0 : i32
    %2 = arith.cmpi ne, %1, %c0_i32_0 : i32
    scf.if %2 {
      %cst_21 = arith.constant 0.000000e+00 : f32
      %37 = vector.broadcast %cst_21 : f32 to vector<8x64xf32>
      %c0_22 = arith.constant 0 : index
      %c0_23 = arith.constant 0 : index
      %38 = vector.load %arg10[%c0_22, %c0_23] : memref<8x64xf32, #tpu.memory_space<vmem>>, vector<8x64xf32>
      tpu.vector_store %arg10[%c0_22, %c0_23], %37 {strides = array<i32>} : memref<8x64xf32, #tpu.memory_space<vmem>>, vector<8x64xf32>,
    } else {
    }
    %c0 = arith.constant 0 : index
    %c0_1 = arith.constant 0 : index
    %c0_2 = arith.constant 0 : index
    %3 = vector.load %arg2[%c0, %c0_1, %c0_2] : memref<1x8x32xf32, #tpu.memory_space<vmem>>, vector<1x8x32xf32>
    %4 = vector.shape_cast %3 : vector<1x8x32xf32> to vector<8x32xf32>
    %5 = arith.truncf %4 : vector<8x32xf32> to vector<8x32xbf16>
    %c0_3 = arith.constant 0 : index
    %c0_4 = arith.constant 0 : index
    %6 = vector.load %arg3[%c0_3, %c0_4] : memref<32x32xbf16, #tpu.memory_space<vmem>>, vector<32x32xbf16>
    %cst = arith.constant dense<0.000000e+00> : vector<8x32xf32>
    %7 = tpu.matmul %5, %6, %cst {dimension_numbers = #tpu.dot_dimension_numbers<[1], [0], [0], [1], [0, 0, 1, 1], [], []>} : vector<8x32xbf16>, vector<32x32xbf16>, vector<8x32xf32> -> vector<8x32xf32>
    %c0_5 = arith.constant 0 : index
    %c0_6 = arith.constant 0 : index
    %8 = vector.load %arg4[%c0_5, %c0_6] : memref<1x32xf32, #tpu.memory_space<vmem>>, vector<1x32xf32>
    %9 = vector.broadcast %8 : vector<1x32xf32> to vector<8x32xf32>
    %10 = arith.addf %7, %9 : vector<8x32xf32>
    %11 = arith.negf %10 : vector<8x32xf32>
    %12 = math.exp %11 : vector<8x32xf32>
    %cst_7 = arith.constant 1.000000e+00 : f32
    %13 = vector.broadcast %cst_7 : f32 to vector<8x32xf32>
    %14 = arith.addf %13, %12 : vector<8x32xf32>
    %15 = arith.divf %13, %14 : vector<8x32xf32>
    %16 = arith.mulf %10, %15 : vector<8x32xf32>
    %17 = arith.truncf %16 : vector<8x32xf32> to vector<8x32xbf16>
    %c0_8 = arith.constant 0 : index
    %c0_9 = arith.constant 0 : index
    %18 = vector.load %arg5[%c0_8, %c0_9] : memref<32x64xbf16, #tpu.memory_space<vmem>>, vector<32x64xbf16>
    %cst_10 = arith.constant dense<0.000000e+00> : vector<8x64xf32>
    %19 = tpu.matmul %17, %18, %cst_10 {dimension_numbers = #tpu.dot_dimension_numbers<[1], [0], [0], [1], [0, 0, 1, 1], [], []>} : vector<8x32xbf16>, vector<32x64xbf16>, vector<8x64xf32> -> vector<8x64xf32>
    %c0_11 = arith.constant 0 : index
    %c0_12 = arith.constant 0 : index
    %20 = vector.load %arg6[%c0_11, %c0_12] : memref<1x64xf32, #tpu.memory_space<vmem>>, vector<1x64xf32>
    %21 = vector.broadcast %20 : vector<1x64xf32> to vector<8x64xf32>
    %22 = arith.addf %19, %21 : vector<8x64xf32>
    %23 = arith.negf %22 : vector<8x64xf32>
    %24 = math.exp %23 : vector<8x64xf32>
    %cst_13 = arith.constant 1.000000e+00 : f32
    %25 = vector.broadcast %cst_13 : f32 to vector<8x64xf32>
    %26 = arith.addf %25, %24 : vector<8x64xf32>
    %27 = arith.divf %25, %26 : vector<8x64xf32>
    %28 = arith.mulf %22, %27 : vector<8x64xf32>
    %c0_14 = arith.constant 0 : index
    %c0_15 = arith.constant 0 : index
    %29 = vector.load %arg10[%c0_14, %c0_15] : memref<8x64xf32, #tpu.memory_space<vmem>>, vector<8x64xf32>
    %30 = vector.shape_cast %28 : vector<8x64xf32> to vector<1x8x64xf32>
    %cst_16 = arith.constant dense<0.000000e+00> : vector<8x64xf32>
    %31 = vector.multi_reduction <add>, %30, %cst_16 [0] : vector<1x8x64xf32> to vector<8x64xf32>
    %32 = arith.addf %29, %31 : vector<8x64xf32>
    %c0_17 = arith.constant 0 : index
    %c0_18 = arith.constant 0 : index
    %33 = vector.load %arg10[%c0_17, %c0_18] : memref<8x64xf32, #tpu.memory_space<vmem>>, vector<8x64xf32>
    tpu.vector_store %arg10[%c0_17, %c0_18], %32 {strides = array<i32>} : memref<8x64xf32, #tpu.memory_space<vmem>>, vector<8x64xf32>,
    %c0_i32_19 = arith.constant 0 : i32
    %34 = arith.cmpi eq, %arg1, %c0_i32_19 : i32
    %35 = arith.extui %34 : i1 to i32
    %c0_i32_20 = arith.constant 0 : i32
    %36 = arith.cmpi ne, %35, %c0_i32_20 : i32
    scf.if %36 {
      %c0_21 = arith.constant 0 : index
      %c0_22 = arith.constant 0 : index
      %37 = vector.load %arg10[%c0_21, %c0_22] : memref<8x64xf32, #tpu.memory_space<vmem>>, vector<8x64xf32>
      %cst_23 = arith.constant dense<0.000000e+00> : vector<64xf32>
      %38 = vector.multi_reduction <add>, %37, %cst_23 [0] : vector<8x64xf32> to vector<64xf32>
      %39 = vector.shape_cast %38 : vector<64xf32> to vector<1x64xf32>
      %cst_24 = arith.constant 1.250000e-01 : f32
      %40 = vector.broadcast %cst_24 : f32 to vector<1x64xf32>
      %41 = arith.mulf %39, %40 : vector<1x64xf32>
      %c0_25 = arith.constant 0 : index
      %c0_26 = arith.constant 0 : index
      %42 = vector.load %arg7[%c0_25, %c0_26] : memref<64x4xf32, #tpu.memory_space<vmem>>, vector<64x4xf32>
      %cst_27 = arith.constant dense<0.000000e+00> : vector<1x4xf32>
      %43 = tpu.matmul %41, %42, %cst_27 {dimension_numbers = #tpu.dot_dimension_numbers<[1], [0], [0], [1], [0, 0, 1, 1], [], []>} : vector<1x64xf32>, vector<64x4xf32>, vector<1x4xf32> -> vector<1x4xf32>
      %c0_28 = arith.constant 0 : index
      %c0_29 = arith.constant 0 : index
      %44 = vector.load %arg8[%c0_28, %c0_29] : memref<1x4xf32, #tpu.memory_space<vmem>>, vector<1x4xf32>
      %45 = arith.addf %43, %44 : vector<1x4xf32>
      %46 = vector.shape_cast %45 : vector<1x4xf32> to vector<1x1x4xf32>
      %c0_30 = arith.constant 0 : index
      %c0_31 = arith.constant 0 : index
      %c0_32 = arith.constant 0 : index
      %47 = vector.load %arg9[%c0_30, %c0_31, %c0_32] : memref<1x1x4xf32, #tpu.memory_space<vmem>>, vector<1x1x4xf32>
      tpu.vector_store %arg9[%c0_30, %c0_31, %c0_32], %46 {strides = array<i32>} : memref<1x1x4xf32, #tpu.memory_space<vmem>>, vector<1x1x4xf32>,
    } else {
    }
    return
  }
  func.func @transform_0(%arg0: i32, %arg1: i32) -> (i32, i32, i32) {
    %c0_i32 = arith.constant 0 : i32
    %c0_i32_0 = arith.constant 0 : i32
    return %arg0, %arg1, %c0_i32 : i32, i32, i32
  }
  func.func @transform_1(%arg0: i32, %arg1: i32) -> (i32, i32) {
    %c0_i32 = arith.constant 0 : i32
    %c0_i32_0 = arith.constant 0 : i32
    %c0_i32_1 = arith.constant 0 : i32
    return %c0_i32, %c0_i32_0 : i32, i32
  }
  func.func @transform_2(%arg0: i32, %arg1: i32) -> (i32, i32) {
    %c0_i32 = arith.constant 0 : i32
    %c0_i32_0 = arith.constant 0 : i32
    %c0_i32_1 = arith.constant 0 : i32
    return %c0_i32, %c0_i32_0 : i32, i32
  }
  func.func @transform_3(%arg0: i32, %arg1: i32) -> (i32, i32) {
    %c0_i32 = arith.constant 0 : i32
    %c0_i32_0 = arith.constant 0 : i32
    %c0_i32_1 = arith.constant 0 : i32
    return %c0_i32, %c0_i32_0 : i32, i32
  }
  func.func @transform_4(%arg0: i32, %arg1: i32) -> (i32, i32) {
    %c0_i32 = arith.constant 0 : i32
    %c0_i32_0 = arith.constant 0 : i32
    %c0_i32_1 = arith.constant 0 : i32
    return %c0_i32, %c0_i32_0 : i32, i32
  }
  func.func @transform_5(%arg0: i32, %arg1: i32) -> (i32, i32) {
    %c0_i32 = arith.constant 0 : i32
    %c0_i32_0 = arith.constant 0 : i32
    %c0_i32_1 = arith.constant 0 : i32
    return %c0_i32, %c0_i32_0 : i32, i32
  }
  func.func @transform_6(%arg0: i32, %arg1: i32) -> (i32, i32) {
    %c0_i32 = arith.constant 0 : i32
    %c0_i32_0 = arith.constant 0 : i32
    %c0_i32_1 = arith.constant 0 : i32
    return %c0_i32, %c0_i32_0 : i32, i32
  }
  func.func @transform_7(%arg0: i32, %arg1: i32) -> (i32, i32, i32) {
    %c0_i32 = arith.constant 0 : i32
    %c0_i32_0 = arith.constant 0 : i32
    %c0_i32_1 = arith.constant 0 : i32
    return %arg0, %c0_i32, %c0_i32_0 : i32, i32, i32
  }
}

</mosaic_0001>

<bundles_post_ra>
// kernel: tpu_custom_call.1
= control target key start
LH: loop header
LB: loop body
LE: loop exit
PB: predicated region body
PF: predicated region fallthrough
CT: control target
= control target key end

     0   :  { %12 = vsyncpa [#allocation4], 0  ;;  %s1072_s0 = inlined_call_operand.vmem [shape: f32[2,8,32], index: 0, kind: input, shape index: {}]   ;;  %s1073_s1 = inlined_call_operand.vmem [shape: bf16[32,32], index: 1, kind: input, shape index: {}]   ;;  %s1074_s2 = inlined_call_operand.vmem [shape: f32[1,32], index: 2, kind: input, shape index: {}]   ;;  %s1075_s3 = inlined_call_operand.vmem [shape: bf16[32,64], index: 3, kind: input, shape index: {}]   ;;  %s1076_s4 = inlined_call_operand.vmem [shape: f32[1,64], index: 4, kind: input, shape index: {}]   ;;  %s1077_s5 = inlined_call_operand.vmem [shape: f32[64,4], index: 5, kind: input, shape index: {}]   ;;  %s1078_s6 = inlined_call_operand.vmem [shape: f32[1,4], index: 6, kind: input, shape index: {}]   ;;  %s1079_s7 = inlined_call_operand.hbm [shape: f32[2,1,4], index: 7, kind: output, shape index: {}]  }
   0x1   :  { %14 = vsyncpa [#allocation4 + $0x1], 0  ;;  %s909_s24 = smov 0   ;;  %s911_s25 = smov 0  }
   0x2   :  { %s913_s26 = smov 0   ;;  %s915_s27 = smov 0  }
   0x3   :  { %s917_s28 = smov 0   ;;  %s919_s29 = smov 0  }
   0x4 LB: > { %s633_s30 = sadd.s32 4294967295, %s863_s29   ;;  %s634_s8 = sadd.s32 4294967294, %s863_s29   ;;  %s863_s29 = sphi %s919_s29, %s20_s29   ;;  %s859_s28 = sphi %s917_s28, %s1086_s28   ;;  %s855_s27 = sphi %s915_s27, %s1085_s27   ;;  %s851_s26 = sphi %s913_s26, %s1084_s26   ;;  %s847_s25 = sphi %s911_s25, %s1083_s25   ;;  %s843_s24 = sphi %s909_s24, %s1082_s24  }
   0x5   : > { %s32_s9 = sadd.s32 1, %s859_s28  ;;  %s193_s10 = sadd.s32 1, %s851_s26 }
   0x6   : > { %p34_p0 = scmp.ge.s32.totalorder %s32_s9, 2  ;;  %p203_p1 = scmp.ne.s32.totalorder %s851_s26, %s847_s25 }
   0x7   : > { %p204_p2 = scmp.eq.s32.totalorder %s633_s30, 1  ;;  %p209_p3 = scmp.ne.s32.totalorder %s847_s25, %s843_s24 }
   0x8   : > { %s1088_s9 = smov (%p34_p0, %s32_s9), 0  ;;  %p210_p5 = scmp.eq.s32.totalorder %s634_s8, 1 }
   0x9   : > { %p949_p4 = por %p204_p2, %p203_p1  ;;  %s190_s12 = ssub.s32 %s859_s28, %s1088_s9 }
   0xa   : > { %p637_p6 = scmp.ge.s32.totalorder %s863_s29, 1  ;;  %p191_p7 = scmp.eq.s32.totalorder %s190_s12, 0 }
   0xb   : > { %p956_p8 = por %p210_p5, %p209_p3  ;;  %p256_p9 = scmp.lt.s32.totalorder %s863_s29, 3 }
   0xc   : > { %s962_s14 = scalar_select %p191_p7, %s851_s26, %s193_s10  }
   0xd   : > { %p257_p10 = pnand %p637_p6, %p256_p9 }
   0xe   : > { %v773_v0 = vld [vmem:[%s1073_s1] sm:$0xff] (!%p257_p10)   ;;  %v865_v1 = vmov (!%p257_p10), 0.0   ;;  %v774_v2 = vld [vmem:[%s1073_s1 + $0x8] sm:$0xff] (!%p257_p10)   ;;  %vm866_vm0 = vmmov (!%p257_p10), 0   ;;  %p289_p11 = scmp.lt.s32.totalorder (!%p257_p10), %s855_s27, 1  ;;  %vm328_vm1 = vcmask (!%p257_p10), 261120  }
   0xf   : > { %260 = sbr.rel (%p257_p10) target bundleno = 768 (0x300), region = 48  ;;  %668 = vmatprep.subr.bf16.mxu1 (!%p257_p10), %v865_v1  ;;  %672 = vmatprep.mubr.msk.bf16.mxu1 (!%p257_p10), %vm866_vm0, %v865_v1  ;;  %v775_v5 = vld [vmem:[%s1075_s3] sm:$0xff] (!%p257_p10)   ;;  %v776_v6 = vld [vmem:[%s1075_s3 + $0x8] sm:$0xff] (!%p257_p10)   ;;  %vm301_vm2 = vcmask (!%p257_p10), 523264   ;;  %v472_v21 = vld [vmem:[%s1077_s5 + $0x10] sm:$0xff] (!%p257_p10)  ;;  %v867_v22 = vmov (!%p257_p10), 0.0|0.0  }
  0x10   : > { %669 = vmatpush3.bf16.msra.mxu1 (!%p257_p10), %v773_v0  ;;  %700 = vmatprep.mubr.msk.f32.mxu0 (!%p257_p10), %vm866_vm0, %v865_v1  ;;  %v639_v7 = vld [vmem:[%s1074_s2] ss:$0 sm:$0xff] (!%p257_p10)  ;;  %302 = vst.msk [vmem:[#allocation2] sm:$0xff] (!%p257_p10), %vm301_vm2, %v865_v1  ;;  %v471_v20 = vld [vmem:[%s1077_s5 + $0x8] sm:$0xff] (!%p257_p10)  ;;  %v473_v24 = vld [vmem:[%s1077_s5 + $0x18] sm:$0xff] (!%p257_p10)  ;;  %s287_s22 = sand.u32 (!%p257_p10), 1, %s847_s25  }
  0x11   : > { %670 = vmatprep.subr.bf16.mxu1 (!%p257_p10), %v865_v1  ;;  %v470_v19 = vld [vmem:[%s1077_s5] sm:$0xff] (!%p257_p10)  ;;  %703 = vmatprep.subr.bf16.mxu0 (!%p257_p10), %v867_v22  ;;  %v707_v25 = vpack.c.bf16 (!%p257_p10), %v473_v24, %v472_v21  ;;  %v475_v27 = vld [vmem:[%s1077_s5 + $0x28] sm:$0xff] (!%p257_p10)  ;;  %v476_v29 = vld [vmem:[%s1077_s5 + $0x30] sm:$0xff] (!%p257_p10)  ;;  %s650_s8 = sshll.u32 (!%p257_p10), %s855_s27, 4  ;;  %s288_s10 = scalar_lea.vmem (!%p257_p10), [#allocation3], %s287_s22  ;;  %vm552_vm3 = vcmask (!%p257_p10), 24576  }
  0x12   : > { %v704_v23 = vpack.c.bf16 (!%p257_p10), %v471_v20, %v470_v19  ;;  %v474_v26 = vld [vmem:[%s1077_s5 + $0x20] sm:$0xff] (!%p257_p10)  ;;  %v477_v30 = vld [vmem:[%s1077_s5 + $0x38] sm:$0xff] (!%p257_p10)  ;;  %s567_s12 = sshll.u32 (!%p257_p10), %s288_s10, 4  ;;  %s1025_s17 = scalar_lea.hbm (!%p257_p10), %s1079_s7, %s650_s8  ;;  %s1027_s12 = int_to_ptr.vmem [resolvable:$true] %s567_s12 }
  0x13   : > { %v710_v28 = vpack.c.bf16 (!%p257_p10), %v475_v27, %v474_v26  ;;  %v713_v31 = vpack.c.bf16 (!%p257_p10), %v477_v30, %v476_v29  ;;  %v644_v32 = vld [vmem:[%s1076_s4] ss:$0 sm:$0xff] (!%p257_p10)  ;;  %s555_s18 = scalar_lea.sflag (!%p257_p10), [#allocation4], %s287_s22 }
  0x14   : > { %671 = vmatpush3.bf16.msra.mxu1 (!%p257_p10), %v774_v2  ;;  %705 = vmatpush3.bf16.msra.mxu0 (!%p257_p10), %v704_v23  ;;  %v478_v54 = vld [vmem:[%s1078_s6] sm:$0x1] (!%p257_p10) }
  0x15   : > { %676 = vmatprep.subr.bf16.mxu1 (!%p257_p10), %v865_v1  ;;  %706 = vmatprep.subr.bf16.mxu0 (!%p257_p10), %v867_v22 }
  0x16   : > { %s290_s19 = scalar_select %p289_p11, %s855_s27, 1 }
  0x17   : > { %v453_v42 = vld [vmem:[#allocation2] sm:$0xff]  ;;  %s868_s27 = smov [#allocation3]  }
  0x18   : > { %s638_s20 = sshll.u32 %s290_s19, 3  ;;  %708 = vmatpush3.bf16.msra.mxu0 %v707_v25  ;;  %s785_s19 = scalar_lea.vmem %s1027_s12, 16 }
  0x19   : > { %s295_s23 = scalar_lea.vmem %s1072_s0, %s638_s20  ;;  %709 = vmatprep.subr.bf16.mxu0 %v867_v22  ;;  %p786_p12 = scmp.ne.s32.totalorder %s1027_s12, %s785_s19 }
  0x1a   : > { %v303_v3 = vld [vmem:[%s295_s23] sm:$0xff]  ;;  %s789_s20 = sshll.u32 %s868_s27, 4  ;;  %s790_s20 = int_to_ptr.vmem [resolvable:$false] %s789_s20 }
  0x1b   : > { %v304_v4 = vpack.c.bf16 %v303_v3, %v303_v3  ;;  %p787_p13 = pnand %p786_p12, %p949_p4  ;;  %s791_s21 = scalar_lea.vmem %s790_s20, 32 }
  0x1c   : > { %711 = vmatpush3.bf16.msra.mxu0 %v710_v28  ;;  %p792_p1 = scmp.lt.s32.totalorder %s1027_s12, %s790_s20  ;;  %p793_p2 = scmp.lt.s32.totalorder %s791_s21, %s785_s19 }
  0x1d   : > { %673 = vmatmul.mubr.msk.bf16.vlgmr.msra.gmra.mrb[0].mxu1 %vm328_vm1, %v304_v4  ;;  %712 = vmatprep.subr.bf16.mxu0 %v867_v22  ;;  %p788_p0 = pneg %p787_p13 }
  0x1e   : > { %680 = vmatprep.mubr.msk.bf16.mxu1 %vm866_vm0, %v865_v1  ;;  %677 = vmatpush3.bf16.msra.mxu1 %v775_v5  ;;  %p794_p3 = por %p793_p2, %p792_p1 }
  0x1f   : > { %678 = vmatprep.subr.bf16.mxu1 %v865_v1 }
  0x20   : > { %714 = vmatpush3.bf16.msra.mxu0 %v713_v31  ;;  %p795_p5 = pnand %p794_p3, %p788_p0 }
  0x22   : > { %679 = vmatpush3.bf16.msra.mxu1 %v776_v6 }
  0xf0   : > { %v366_v8 = vpop.f32.mrb[0].mxu1 }
  0xf1   : > { %v367_v9 = vadd.f32 %v639_v7, %v366_v8  ;;  %v674_v10 = vpop.f32.mrb[1].mxu1 }
  0xf2   : > { %v369_v11 = vpop.f32.mrb[2].mxu1 }
  0xf3   : > { %v643_v12 = vmul.f32 -1.442695, %v367_v9  ;;  %v675_v13 = vpop.f32.mrb[3].mxu1 }
  0xf5   : > { %777 = vpow2.f32 %v643_v12 }
  0xff   : > { %v778_v14 = vpop.eup %777 }
 0x100   : > { %v375_v15 = vadd.f32 1.0, %v778_v14 }
 0x102   : > { %779 = vrcp.f32 %v375_v15 }
 0x10c   : > { %v780_v16 = vpop.eup %779 }
 0x10d   : > { %v378_v17 = vmul.f32 %v780_v16, %v367_v9 }
 0x10f   : > { %v379_v18 = vpack.c.bf16 %v378_v17, %v378_v17 }
 0x111   : > { %681 = vmatmul.mubr.msk.bf16.vlgmr.msra.gmra.mrb[4].mxu1 %vm328_vm1, %v379_v18 }
 0x1e4   : > { %v440_v33 = vpop.f32.mrb[4].mxu1 }
 0x1e5   : > { %v441_v34 = vadd.f32 %v644_v32, %v440_v33  ;;  %v682_v35 = vpop.f32.mrb[5].mxu1 }
 0x1e6   : > { %v443_v36 = vpop.f32.mrb[6].mxu1 }
 0x1e7   : > { %v648_v37 = vmul.f32 -1.442695, %v441_v34  ;;  %v683_v38 = vpop.f32.mrb[7].mxu1 }
 0x1e9   : > { %781 = vpow2.f32 %v648_v37 }
 0x1f3   : > { %v782_v39 = vpop.eup %781 }
 0x1f4   : > { %v449_v40 = vadd.f32 1.0, %v782_v39 }
 0x1f6   : > { %783 = vrcp.f32 %v449_v40 }
 0x200   : > { %v784_v41 = vpop.eup %783 }
 0x201   : > { %v452_v43 = vmul.f32 %v784_v41, %v441_v34 }
 0x203   : > { %v455_v44 = vadd.f32 %v453_v42, %v452_v43 }
 0x205   : > { %457 = vst.msk [vmem:[#allocation2] sm:$0xff] %vm301_vm2, %v455_v44 }
 0x20c   : > { %v461_v45 = vld [vmem:[#allocation2] sm:$0xff] }
 0x20d   : > { %v462_v46 = vsel %vm301_vm2, %v461_v45, 0.0 }
 0x20e   : > { %v463_v47 = vrot.slane %v462_v46, 4 }
 0x210   : > { %v464_v48 = vadd.f32 %v463_v47, %v462_v46 }
 0x212   : > { %v465_v49 = vrot.slane %v464_v48, 2 }
 0x214   : > { %v466_v50 = vadd.f32 %v465_v49, %v464_v48 }
 0x216   : > { %v467_v51 = vrot.slane %v466_v50, 1 }
 0x218   : > { %v468_v52 = vadd.f32 %v467_v51, %v466_v50 }
 0x21a   : > { %v469_v53 = vmul.f32 0.125, %v468_v52 }
 0x21c   : > { %701 = vmatmul.mubr.msk.f32.vlgmr.msra.gmra.mrb[0].mxu0 %vm301_vm2, %v469_v53 }
 0x2ef   : > { %v548_v55 = vpop.f32.mrb[0].mxu0 }
 0x2f0   : > { %v549_v56 = vadd.f32 %v548_v55, %v478_v54  ;;  %v702_v57 = vpop.f32.mrb[1].mxu0 }
 0x2f2   : > { %553 = vst.msk [vmem:[%s288_s10] sm:$0x1] %vm552_vm3, %v549_v56 }
 0x2f3   : > { %798 = shalt.err (!%p795_p5)
}
 0x2f4   : > { %s799_s22 = scalar_lea.hbm %s1025_s17, 16  ;;  %s803_s8 = scalar_lea.hbm %s1079_s7, 32 }
 0x2f5   : > { %p800_p6 = scmp.ne.s32.totalorder %s1025_s17, %s799_s22  ;;  %p804_p10 = scmp.lt.u32.totalorder %s1025_s17, %s1079_s7 }
 0x2f6   : > { %p805_p11 = scmp.lt.u32.totalorder %s803_s8, %s799_s22  ;;  %p807_p13 = scmp.lt.u32.totalorder %s799_s22, %s1025_s17 }
 0x2f7   : > { %p801_p7 = pnand %p800_p6, %p949_p4 }
 0x2f8   : > { %p806_p12 = por %p805_p11, %p804_p10 }
 0x2f9   : > { %p802_p9 = pneg %p801_p7 }
 0x2fa   : > { %p808_p0 = por %p807_p13, %p806_p12 }
 0x2fc   : > { %p809_p1 = pnand %p808_p0, %p802_p9 }
 0x2fe   : > { %812 = shalt.err (!%p809_p1)
}
 0x2ff   : > { %715 = dma.vmem_to_hbm [thread:$0]  (%p949_p4), %s1027_s12, 16, %s1025_s17, %s555_s18  }
 0x300 PF: > { %p721_p2 = scmp.ge.s32.totalorder %s863_s29, 2  ;;  %s579_s16 = sand.u32 1, %s843_s24  }
 0x301   : > { %s580_s19 = scalar_lea.sflag [#allocation4], %s579_s16 }
 0x302   : > { %p718_p3 = pnand %p721_p2, %p956_p8 }
 0x304   : > { %838 = dma.done.wait (!%p718_p3), %s580_s19, 16  }
 0x305   : > { %840 = vsyncadd (!%p718_p3), %s580_s19, 4294967280  ;;  %s20_s29 = sadd.s32 1, %s863_s29   ;;  %s1082_s24 = smov %s847_s25 }
 0x306   : > { %p17_p5 = scmp.ge.s32.totalorder %s20_s29, 4   ;;  %s1083_s25 = smov %s851_s26 }
 0x307   : > { %s1084_s26 = smov %s962_s14  ;;  %s1085_s27 = smov %s859_s28 }
 0x308   : > { %s1086_s28 = smov %s1088_s9  ;;  %19 = sbr.rel (!%p17_p5) target bundleno = 4 (0x4), region = 91 }
 0x30f   :  { %584 = vsyncpa [#allocation4], 1 }
 0x310   :  { %586 = vsyncpa [#allocation4 + $0x1], 1 }

</bundles_post_ra>
